<compile_context>
chip_gen: v7x
topology: tpu7x:2x2x1
jax: 0.10.0
libtpu: 0.0.40
codegen_flags: <defaults>
</compile_context>

<pallas_src>
import jax
import jax.numpy as jnp
from jax import lax
from jax.experimental import pallas as pl
from jax.experimental.pallas import tpu as pltpu


def residual_block_kernel(x_ref, bw1_ref, b1_ref, bw2_ref, b2_ref, out_ref, pad_ref):
    # x_ref   : (NB, H, W*C) f32   lane-dense input slab (NB batch elements / step)
    # bw*_ref : (3, W*C, W*C) bf16 per-ky banded conv weights (kx folded in)
    # b*_ref  : (1, W*C)     f32   bias, tiled over the W lane blocks
    # out_ref : (NB, H, W*C)       lane-dense output slab
    # pad_ref : (H+2, W*C)   bf16  row-padded activation scratch (shared by both convs)
    nb, h, wc = x_ref.shape

    # Zero only the two border rows (needed for the ky shifts).  Re-done every grid
    # step so the kernel stays correct if the "parallel" batch axis is split across
    # TensorCores (scratch is per-core); it is just 2 small dense stores.
    zrow = jnp.zeros((1, wc), pad_ref.dtype)
    pad_ref[0:1, :] = zrow
    pad_ref[h + 1:h + 2, :] = zrow

    def conv(bw_ref, b_ref):
        # 3 accumulating MXU matmuls (one per ky); kx and the SAME-padding columns are
        # absorbed into the banded bf16 weights.  f32 accumulation.
        acc = jnp.dot(pad_ref[0:h, :], bw_ref[0], preferred_element_type=jnp.float32)
        acc += jnp.dot(pad_ref[1:h + 1, :], bw_ref[1], preferred_element_type=jnp.float32)
        acc += jnp.dot(pad_ref[2:h + 2, :], bw_ref[2], preferred_element_type=jnp.float32)
        return acc + b_ref[...]

    for b in range(nb):                                    # small static unroll
        x_b = x_ref[b]                                     # (H, W*C) f32, one dense load
        pad_ref[1:h + 1, :] = x_b.astype(pad_ref.dtype)    # conv1 input
        h1 = jnp.maximum(conv(bw1_ref, b1_ref), 0.0)       # f32
        pad_ref[1:h + 1, :] = h1.astype(pad_ref.dtype)     # conv2 input (border still 0)
        y = conv(bw2_ref, b2_ref) + x_b                    # residual add in f32
        out_ref[b] = y.astype(out_ref.dtype)               # ONE dense (H, W*C) store


def _band_weights(w_hwio, width):
    """Fold the kx taps of a 3x3 HWIO conv kernel into per-ky banded matrices.

    band[ky, (w + kx - 1)*C + ci, w*C + co] = w_hwio[ky, kx, ci, co]
    (entries with w + kx - 1 outside [0, width) multiply SAME-padding zeros and are
    simply dropped).  With lane-packed activation rows a[r, w*C + ci]:
        conv(x)[h, :] = sum_ky  a_padrows[h + ky, :] @ band[ky]
    """
    C = w_hwio.shape[2]
    band = jnp.zeros((3, width * C, width * C), w_hwio.dtype)
    for kx in range(3):
        for w in range(width):
            src = w + kx - 1
            if 0 <= src < width:
                band = band.at[:, src * C:(src + 1) * C, w * C:(w + 1) * C].set(
                    w_hwio[:, kx])
    return band


def _vmem_limit_bytes():
    """Generation-aware scoped-VMEM cap (v7x: 64 MiB physical; v5e/v6e: 128 MiB)."""
    phys = 64 * 1024 * 1024
    try:
        phys = int(pltpu.get_tpu_info().vmem_capacity_bytes)
    except Exception:
        pass
    return max(32 * 1024 * 1024, min(phys - 16 * 1024 * 1024, 100 * 1024 * 1024))


def residual_block(x_nchw, w1, b1, w2, b2):
    """x_nchw: (N, C, H, W); w1, w2: (3, 3, C, C) in HWIO; b1, b2: (C,).

    (PyTorch OIHW conv weights convert to HWIO via w.transpose(2, 3, 1, 0).)
    """
    N, C, H, W = x_nchw.shape
    WC = W * C
    # Lane-packed input slab: NCHW -> NHWC -> (N, H, W*C) (free contiguous reshape).
    x = jnp.transpose(x_nchw, (0, 2, 3, 1)).reshape(N, H, WC)

    bw1 = _band_weights(w1, W).astype(jnp.bfloat16)          # (3, W*C, W*C)
    bw2 = _band_weights(w2, W).astype(jnp.bfloat16)
    b1p = jnp.tile(b1, W).reshape(1, WC).astype(jnp.float32)
    b2p = jnp.tile(b2, W).reshape(1, WC).astype(jnp.float32)

    # Batch elements per grid step (amortizes per-step overhead at tiny shapes).
    nb = 1
    for cand in (4, 2):
        if N % cand == 0:
            nb = cand
            break

    out_packed = pl.pallas_call(
        residual_block_kernel,
        out_shape=jax.ShapeDtypeStruct((N, H, WC), x.dtype),
        grid_spec=pltpu.PrefetchScalarGridSpec(
            num_scalar_prefetch=0,
            grid=(N // nb,),
            in_specs=[
                pl.BlockSpec((nb, H, WC), lambda n: (n, 0, 0)),
                pl.BlockSpec((3, WC, WC), lambda n: (0, 0, 0)),
                pl.BlockSpec((1, WC), lambda n: (0, 0)),
                pl.BlockSpec((3, WC, WC), lambda n: (0, 0, 0)),
                pl.BlockSpec((1, WC), lambda n: (0, 0)),
            ],
            out_specs=pl.BlockSpec((nb, H, WC), lambda n: (n, 0, 0)),
            scratch_shapes=[
                pltpu.VMEM((H + 2, WC), jnp.bfloat16),   # row-padded activations
            ],
        ),
        compiler_params=pltpu.CompilerParams(
            dimension_semantics=("parallel",),
            vmem_limit_bytes=_vmem_limit_bytes()),
    )(x, bw1, b1p, bw2, b2p)

    out_nhwc = out_packed.reshape(N, H, W, C)
    return jnp.transpose(out_nhwc, (0, 3, 1, 2))             # NHWC -> NCHW


def _reference(x_nchw, w1, b1, w2, b2):
    """Pure-JAX reference: same math as the PyTorch module, with the same
    bf16-operand / f32-accumulation convolutions the kernel uses on the MXU."""
    x = jnp.transpose(x_nchw, (0, 2, 3, 1))
    dn = ('NHWC', 'HWIO', 'NHWC')
    y = lax.conv_general_dilated(
        x.astype(jnp.bfloat16), w1.astype(jnp.bfloat16), (1, 1), 'SAME',
        dimension_numbers=dn, preferred_element_type=jnp.float32)
    y = jnp.maximum(y + b1, 0.0)
    y = lax.conv_general_dilated(
        y.astype(jnp.bfloat16), w2.astype(jnp.bfloat16), (1, 1), 'SAME',
        dimension_numbers=dn, preferred_element_type=jnp.float32)
    y = y + b2 + x
    return jnp.transpose(y, (0, 3, 1, 2))


if __name__ == "__main__":
    N, C, H, W = 2, 8, 16, 16   # W*C = 128 -> fully lane-dense slabs

    key = jax.random.PRNGKey(0)
    kx_, k1, k2, k3, k4 = jax.random.split(key, 5)

    x = jax.random.normal(kx_, (N, C, H, W), jnp.float32)
    # Synthetic parameters of nn.Conv2d(C, C, 3, padding=1), stored HWIO = (3,3,Cin,Cout).
    w1 = jax.random.normal(k1, (3, 3, C, C), jnp.float32) * 0.1
    b1 = jax.random.normal(k2, (C,), jnp.float32) * 0.1
    w2 = jax.random.normal(k3, (3, 3, C, C), jnp.float32) * 0.1
    b2 = jax.random.normal(k4, (C,), jnp.float32) * 0.1

    out = residual_block(x, w1, b1, w2, b2)
    jax.block_until_ready(out)

    ref = _reference(x, w1, b1, w2, b2)
    assert out.shape == (N, C, H, W)
    max_err = jnp.max(jnp.abs(out - ref))
    assert jnp.allclose(out, ref, atol=2e-2, rtol=2e-2), f"mismatch vs reference (max abs err {max_err})"

    print("KERNEL_OK")
</pallas_src>

<mosaic_0001>
module attributes {stable_mosaic.version = 11 : i64} {
  func.func @residual_block_kernel(%arg0: i32, %arg1: memref<2x16x128xf32, #tpu.memory_space<vmem>>, %arg2: memref<3x128x128xbf16, #tpu.memory_space<vmem>>, %arg3: memref<1x128xf32, #tpu.memory_space<vmem>>, %arg4: memref<3x128x128xbf16, #tpu.memory_space<vmem>>, %arg5: memref<1x128xf32, #tpu.memory_space<vmem>>, %arg6: memref<2x16x128xf32, #tpu.memory_space<vmem>>, %arg7: memref<18x128xbf16, #tpu.memory_space<vmem>>) attributes {dimension_semantics = [#tpu.dimension_semantics<parallel>], iteration_bounds = array<i64: 1>, scalar_prefetch = 0 : i64, scratch_operands = 1 : i64, tpu.core_type = #tpu.core_type<tc>, window_params = [{transform_indices = @transform_0, window_bounds = array<i64: 2, 16, 128>}, {pipeline_mode = #tpu.pipeline_mode<synchronous>, transform_indices = @transform_1, window_bounds = array<i64: 3, 128, 128>}, {pipeline_mode = #tpu.pipeline_mode<synchronous>, transform_indices = @transform_2, window_bounds = array<i64: 1, 128>}, {pipeline_mode = #tpu.pipeline_mode<synchronous>, transform_indices = @transform_3, window_bounds = array<i64: 3, 128, 128>}, {pipeline_mode = #tpu.pipeline_mode<synchronous>, transform_indices = @transform_4, window_bounds = array<i64: 1, 128>}, {transform_indices = @transform_5, window_bounds = array<i64: 2, 16, 128>}]} {
    %cst = arith.constant 0.000000e+00 : bf16
    %0 = vector.broadcast %cst : bf16 to vector<1x128xbf16>
    %c0 = arith.constant 0 : index
    %c0_0 = arith.constant 0 : index
    %1 = vector.load %arg7[%c0, %c0_0] : memref<18x128xbf16, #tpu.memory_space<vmem>>, vector<1x128xbf16>
    tpu.vector_store %arg7[%c0, %c0_0], %0 {strides = array<i32>} : memref<18x128xbf16, #tpu.memory_space<vmem>>, vector<1x128xbf16>,
    %c17 = arith.constant 17 : index
    %c0_1 = arith.constant 0 : index
    %2 = vector.load %arg7[%c17, %c0_1] : memref<18x128xbf16, #tpu.memory_space<vmem>>, vector<1x128xbf16>
    tpu.vector_store %arg7[%c17, %c0_1], %0 {strides = array<i32>} : memref<18x128xbf16, #tpu.memory_space<vmem>>, vector<1x128xbf16>,
    %c0_2 = arith.constant 0 : index
    %c0_3 = arith.constant 0 : index
    %c0_4 = arith.constant 0 : index
    %3 = vector.load %arg1[%c0_2, %c0_3, %c0_4] : memref<2x16x128xf32, #tpu.memory_space<vmem>>, vector<1x16x128xf32>
    %4 = vector.shape_cast %3 : vector<1x16x128xf32> to vector<16x128xf32>
    %5 = arith.truncf %4 : vector<16x128xf32> to vector<16x128xbf16>
    %c1 = arith.constant 1 : index
    %c0_5 = arith.constant 0 : index
    %6 = vector.load %arg7[%c1, %c0_5] : memref<18x128xbf16, #tpu.memory_space<vmem>>, vector<16x128xbf16>
    tpu.vector_store %arg7[%c1, %c0_5], %5 {strides = array<i32>} : memref<18x128xbf16, #tpu.memory_space<vmem>>, vector<16x128xbf16>,
    %c0_6 = arith.constant 0 : index
    %c0_7 = arith.constant 0 : index
    %7 = vector.load %arg7[%c0_6, %c0_7] : memref<18x128xbf16, #tpu.memory_space<vmem>>, vector<16x128xbf16>
    %c0_8 = arith.constant 0 : index
    %c0_9 = arith.constant 0 : index
    %c0_10 = arith.constant 0 : index
    %8 = vector.load %arg2[%c0_8, %c0_9, %c0_10] : memref<3x128x128xbf16, #tpu.memory_space<vmem>>, vector<1x128x128xbf16>
    %9 = vector.shape_cast %8 : vector<1x128x128xbf16> to vector<128x128xbf16>
    %cst_11 = arith.constant dense<0.000000e+00> : vector<16x128xf32>
    %10 = tpu.matmul %7, %9, %cst_11 {dimension_numbers = #tpu.dot_dimension_numbers<[1], [0], [0], [1], [0, 0, 1, 1], [], []>} : vector<16x128xbf16>, vector<128x128xbf16>, vector<16x128xf32> -> vector<16x128xf32>
    %c1_12 = arith.constant 1 : index
    %c0_13 = arith.constant 0 : index
    %11 = vector.load %arg7[%c1_12, %c0_13] : memref<18x128xbf16, #tpu.memory_space<vmem>>, vector<16x128xbf16>
    %c1_14 = arith.constant 1 : index
    %c0_15 = arith.constant 0 : index
    %c0_16 = arith.constant 0 : index
    %12 = vector.load %arg2[%c1_14, %c0_15, %c0_16] : memref<3x128x128xbf16, #tpu.memory_space<vmem>>, vector<1x128x128xbf16>
    %13 = vector.shape_cast %12 : vector<1x128x128xbf16> to vector<128x128xbf16>
    %cst_17 = arith.constant dense<0.000000e+00> : vector<16x128xf32>
    %14 = tpu.matmul %11, %13, %cst_17 {dimension_numbers = #tpu.dot_dimension_numbers<[1], [0], [0], [1], [0, 0, 1, 1], [], []>} : vector<16x128xbf16>, vector<128x128xbf16>, vector<16x128xf32> -> vector<16x128xf32>
    %15 = arith.addf %10, %14 : vector<16x128xf32>
    %c2 = arith.constant 2 : index
    %c0_18 = arith.constant 0 : index
    %16 = vector.load %arg7[%c2, %c0_18] : memref<18x128xbf16, #tpu.memory_space<vmem>>, vector<16x128xbf16>
    %c2_19 = arith.constant 2 : index
    %c0_20 = arith.constant 0 : index
    %c0_21 = arith.constant 0 : index
    %17 = vector.load %arg2[%c2_19, %c0_20, %c0_21] : memref<3x128x128xbf16, #tpu.memory_space<vmem>>, vector<1x128x128xbf16>
    %18 = vector.shape_cast %17 : vector<1x128x128xbf16> to vector<128x128xbf16>
    %cst_22 = arith.constant dense<0.000000e+00> : vector<16x128xf32>
    %19 = tpu.matmul %16, %18, %cst_22 {dimension_numbers = #tpu.dot_dimension_numbers<[1], [0], [0], [1], [0, 0, 1, 1], [], []>} : vector<16x128xbf16>, vector<128x128xbf16>, vector<16x128xf32> -> vector<16x128xf32>
    %20 = arith.addf %15, %19 : vector<16x128xf32>
    %c0_23 = arith.constant 0 : index
    %c0_24 = arith.constant 0 : index
    %21 = vector.load %arg3[%c0_23, %c0_24] : memref<1x128xf32, #tpu.memory_space<vmem>>, vector<1x128xf32>
    %22 = vector.broadcast %21 : vector<1x128xf32> to vector<16x128xf32>
    %23 = arith.addf %20, %22 : vector<16x128xf32>
    %cst_25 = arith.constant 0.000000e+00 : f32
    %24 = vector.broadcast %cst_25 : f32 to vector<16x128xf32>
    %25 = arith.maximumf %23, %24 : vector<16x128xf32>
    %26 = arith.truncf %25 : vector<16x128xf32> to vector<16x128xbf16>
    %c1_26 = arith.constant 1 : index
    %c0_27 = arith.constant 0 : index
    %27 = vector.load %arg7[%c1_26, %c0_27] : memref<18x128xbf16, #tpu.memory_space<vmem>>, vector<16x128xbf16>
    tpu.vector_store %arg7[%c1_26, %c0_27], %26 {strides = array<i32>} : memref<18x128xbf16, #tpu.memory_space<vmem>>, vector<16x128xbf16>,
    %c0_28 = arith.constant 0 : index
    %c0_29 = arith.constant 0 : index
    %28 = vector.load %arg7[%c0_28, %c0_29] : memref<18x128xbf16, #tpu.memory_space<vmem>>, vector<16x128xbf16>
    %c0_30 = arith.constant 0 : index
    %c0_31 = arith.constant 0 : index
    %c0_32 = arith.constant 0 : index
    %29 = vector.load %arg4[%c0_30, %c0_31, %c0_32] : memref<3x128x128xbf16, #tpu.memory_space<vmem>>, vector<1x128x128xbf16>
    %30 = vector.shape_cast %29 : vector<1x128x128xbf16> to vector<128x128xbf16>
    %cst_33 = arith.constant dense<0.000000e+00> : vector<16x128xf32>
    %31 = tpu.matmul %28, %30, %cst_33 {dimension_numbers = #tpu.dot_dimension_numbers<[1], [0], [0], [1], [0, 0, 1, 1], [], []>} : vector<16x128xbf16>, vector<128x128xbf16>, vector<16x128xf32> -> vector<16x128xf32>
    %c1_34 = arith.constant 1 : index
    %c0_35 = arith.constant 0 : index
    %32 = vector.load %arg7[%c1_34, %c0_35] : memref<18x128xbf16, #tpu.memory_space<vmem>>, vector<16x128xbf16>
    %c1_36 = arith.constant 1 : index
    %c0_37 = arith.constant 0 : index
    %c0_38 = arith.constant 0 : index
    %33 = vector.load %arg4[%c1_36, %c0_37, %c0_38] : memref<3x128x128xbf16, #tpu.memory_space<vmem>>, vector<1x128x128xbf16>
    %34 = vector.shape_cast %33 : vector<1x128x128xbf16> to vector<128x128xbf16>
    %cst_39 = arith.constant dense<0.000000e+00> : vector<16x128xf32>
    %35 = tpu.matmul %32, %34, %cst_39 {dimension_numbers = #tpu.dot_dimension_numbers<[1], [0], [0], [1], [0, 0, 1, 1], [], []>} : vector<16x128xbf16>, vector<128x128xbf16>, vector<16x128xf32> -> vector<16x128xf32>
    %36 = arith.addf %31, %35 : vector<16x128xf32>
    %c2_40 = arith.constant 2 : index
    %c0_41 = arith.constant 0 : index
    %37 = vector.load %arg7[%c2_40, %c0_41] : memref<18x128xbf16, #tpu.memory_space<vmem>>, vector<16x128xbf16>
    %c2_42 = arith.constant 2 : index
    %c0_43 = arith.constant 0 : index
    %c0_44 = arith.constant 0 : index
    %38 = vector.load %arg4[%c2_42, %c0_43, %c0_44] : memref<3x128x128xbf16, #tpu.memory_space<vmem>>, vector<1x128x128xbf16>
    %39 = vector.shape_cast %38 : vector<1x128x128xbf16> to vector<128x128xbf16>
    %cst_45 = arith.constant dense<0.000000e+00> : vector<16x128xf32>
    %40 = tpu.matmul %37, %39, %cst_45 {dimension_numbers = #tpu.dot_dimension_numbers<[1], [0], [0], [1], [0, 0, 1, 1], [], []>} : vector<16x128xbf16>, vector<128x128xbf16>, vector<16x128xf32> -> vector<16x128xf32>
    %41 = arith.addf %36, %40 : vector<16x128xf32>
    %c0_46 = arith.constant 0 : index
    %c0_47 = arith.constant 0 : index
    %42 = vector.load %arg5[%c0_46, %c0_47] : memref<1x128xf32, #tpu.memory_space<vmem>>, vector<1x128xf32>
    %43 = vector.broadcast %42 : vector<1x128xf32> to vector<16x128xf32>
    %44 = arith.addf %41, %43 : vector<16x128xf32>
    %45 = arith.addf %44, %4 : vector<16x128xf32>
    %c0_48 = arith.constant 0 : index
    %c0_49 = arith.constant 0 : index
    %c0_50 = arith.constant 0 : index
    %46 = vector.load %arg6[%c0_48, %c0_49, %c0_50] : memref<2x16x128xf32, #tpu.memory_space<vmem>>, vector<1x16x128xf32>
    %47 = vector.shape_cast %46 : vector<1x16x128xf32> to vector<16x128xf32>
    %48 = vector.shape_cast %45 : vector<16x128xf32> to vector<1x16x128xf32>
    tpu.vector_store %arg6[%c0_48, %c0_49, %c0_50], %48 {strides = array<i32>} : memref<2x16x128xf32, #tpu.memory_space<vmem>>, vector<1x16x128xf32>,
    %c1_51 = arith.constant 1 : index
    %c0_52 = arith.constant 0 : index
    %c0_53 = arith.constant 0 : index
    %49 = vector.load %arg1[%c1_51, %c0_52, %c0_53] : memref<2x16x128xf32, #tpu.memory_space<vmem>>, vector<1x16x128xf32>
    %50 = vector.shape_cast %49 : vector<1x16x128xf32> to vector<16x128xf32>
    %51 = arith.truncf %50 : vector<16x128xf32> to vector<16x128xbf16>
    %c1_54 = arith.constant 1 : index
    %c0_55 = arith.constant 0 : index
    %52 = vector.load %arg7[%c1_54, %c0_55] : memref<18x128xbf16, #tpu.memory_space<vmem>>, vector<16x128xbf16>
    tpu.vector_store %arg7[%c1_54, %c0_55], %51 {strides = array<i32>} : memref<18x128xbf16, #tpu.memory_space<vmem>>, vector<16x128xbf16>,
    %c0_56 = arith.constant 0 : index
    %c0_57 = arith.constant 0 : index
    %53 = vector.load %arg7[%c0_56, %c0_57] : memref<18x128xbf16, #tpu.memory_space<vmem>>, vector<16x128xbf16>
    %c0_58 = arith.constant 0 : index
    %c0_59 = arith.constant 0 : index
    %c0_60 = arith.constant 0 : index
    %54 = vector.load %arg2[%c0_58, %c0_59, %c0_60] : memref<3x128x128xbf16, #tpu.memory_space<vmem>>, vector<1x128x128xbf16>
    %55 = vector.shape_cast %54 : vector<1x128x128xbf16> to vector<128x128xbf16>
    %cst_61 = arith.constant dense<0.000000e+00> : vector<16x128xf32>
    %56 = tpu.matmul %53, %55, %cst_61 {dimension_numbers = #tpu.dot_dimension_numbers<[1], [0], [0], [1], [0, 0, 1, 1], [], []>} : vector<16x128xbf16>, vector<128x128xbf16>, vector<16x128xf32> -> vector<16x128xf32>
    %c1_62 = arith.constant 1 : index
    %c0_63 = arith.constant 0 : index
    %57 = vector.load %arg7[%c1_62, %c0_63] : memref<18x128xbf16, #tpu.memory_space<vmem>>, vector<16x128xbf16>
    %c1_64 = arith.constant 1 : index
    %c0_65 = arith.constant 0 : index
    %c0_66 = arith.constant 0 : index
    %58 = vector.load %arg2[%c1_64, %c0_65, %c0_66] : memref<3x128x128xbf16, #tpu.memory_space<vmem>>, vector<1x128x128xbf16>
    %59 = vector.shape_cast %58 : vector<1x128x128xbf16> to vector<128x128xbf16>
    %cst_67 = arith.constant dense<0.000000e+00> : vector<16x128xf32>
    %60 = tpu.matmul %57, %59, %cst_67 {dimension_numbers = #tpu.dot_dimension_numbers<[1], [0], [0], [1], [0, 0, 1, 1], [], []>} : vector<16x128xbf16>, vector<128x128xbf16>, vector<16x128xf32> -> vector<16x128xf32>
    %61 = arith.addf %56, %60 : vector<16x128xf32>
    %c2_68 = arith.constant 2 : index
    %c0_69 = arith.constant 0 : index
    %62 = vector.load %arg7[%c2_68, %c0_69] : memref<18x128xbf16, #tpu.memory_space<vmem>>, vector<16x128xbf16>
    %c2_70 = arith.constant 2 : index
    %c0_71 = arith.constant 0 : index
    %c0_72 = arith.constant 0 : index
    %63 = vector.load %arg2[%c2_70, %c0_71, %c0_72] : memref<3x128x128xbf16, #tpu.memory_space<vmem>>, vector<1x128x128xbf16>
    %64 = vector.shape_cast %63 : vector<1x128x128xbf16> to vector<128x128xbf16>
    %cst_73 = arith.constant dense<0.000000e+00> : vector<16x128xf32>
    %65 = tpu.matmul %62, %64, %cst_73 {dimension_numbers = #tpu.dot_dimension_numbers<[1], [0], [0], [1], [0, 0, 1, 1], [], []>} : vector<16x128xbf16>, vector<128x128xbf16>, vector<16x128xf32> -> vector<16x128xf32>
    %66 = arith.addf %61, %65 : vector<16x128xf32>
    %c0_74 = arith.constant 0 : index
    %c0_75 = arith.constant 0 : index
    %67 = vector.load %arg3[%c0_74, %c0_75] : memref<1x128xf32, #tpu.memory_space<vmem>>, vector<1x128xf32>
    %68 = vector.broadcast %67 : vector<1x128xf32> to vector<16x128xf32>
    %69 = arith.addf %66, %68 : vector<16x128xf32>
    %cst_76 = arith.constant 0.000000e+00 : f32
    %70 = vector.broadcast %cst_76 : f32 to vector<16x128xf32>
    %71 = arith.maximumf %69, %70 : vector<16x128xf32>
    %72 = arith.truncf %71 : vector<16x128xf32> to vector<16x128xbf16>
    %c1_77 = arith.constant 1 : index
    %c0_78 = arith.constant 0 : index
    %73 = vector.load %arg7[%c1_77, %c0_78] : memref<18x128xbf16, #tpu.memory_space<vmem>>, vector<16x128xbf16>
    tpu.vector_store %arg7[%c1_77, %c0_78], %72 {strides = array<i32>} : memref<18x128xbf16, #tpu.memory_space<vmem>>, vector<16x128xbf16>,
    %c0_79 = arith.constant 0 : index
    %c0_80 = arith.constant 0 : index
    %74 = vector.load %arg7[%c0_79, %c0_80] : memref<18x128xbf16, #tpu.memory_space<vmem>>, vector<16x128xbf16>
    %c0_81 = arith.constant 0 : index
    %c0_82 = arith.constant 0 : index
    %c0_83 = arith.constant 0 : index
    %75 = vector.load %arg4[%c0_81, %c0_82, %c0_83] : memref<3x128x128xbf16, #tpu.memory_space<vmem>>, vector<1x128x128xbf16>
    %76 = vector.shape_cast %75 : vector<1x128x128xbf16> to vector<128x128xbf16>
    %cst_84 = arith.constant dense<0.000000e+00> : vector<16x128xf32>
    %77 = tpu.matmul %74, %76, %cst_84 {dimension_numbers = #tpu.dot_dimension_numbers<[1], [0], [0], [1], [0, 0, 1, 1], [], []>} : vector<16x128xbf16>, vector<128x128xbf16>, vector<16x128xf32> -> vector<16x128xf32>
    %c1_85 = arith.constant 1 : index
    %c0_86 = arith.constant 0 : index
    %78 = vector.load %arg7[%c1_85, %c0_86] : memref<18x128xbf16, #tpu.memory_space<vmem>>, vector<16x128xbf16>
    %c1_87 = arith.constant 1 : index
    %c0_88 = arith.constant 0 : index
    %c0_89 = arith.constant 0 : index
    %79 = vector.load %arg4[%c1_87, %c0_88, %c0_89] : memref<3x128x128xbf16, #tpu.memory_space<vmem>>, vector<1x128x128xbf16>
    %80 = vector.shape_cast %79 : vector<1x128x128xbf16> to vector<128x128xbf16>
    %cst_90 = arith.constant dense<0.000000e+00> : vector<16x128xf32>
    %81 = tpu.matmul %78, %80, %cst_90 {dimension_numbers = #tpu.dot_dimension_numbers<[1], [0], [0], [1], [0, 0, 1, 1], [], []>} : vector<16x128xbf16>, vector<128x128xbf16>, vector<16x128xf32> -> vector<16x128xf32>
    %82 = arith.addf %77, %81 : vector<16x128xf32>
    %c2_91 = arith.constant 2 : index
    %c0_92 = arith.constant 0 : index
    %83 = vector.load %arg7[%c2_91, %c0_92] : memref<18x128xbf16, #tpu.memory_space<vmem>>, vector<16x128xbf16>
    %c2_93 = arith.constant 2 : index
    %c0_94 = arith.constant 0 : index
    %c0_95 = arith.constant 0 : index
    %84 = vector.load %arg4[%c2_93, %c0_94, %c0_95] : memref<3x128x128xbf16, #tpu.memory_space<vmem>>, vector<1x128x128xbf16>
    %85 = vector.shape_cast %84 : vector<1x128x128xbf16> to vector<128x128xbf16>
    %cst_96 = arith.constant dense<0.000000e+00> : vector<16x128xf32>
    %86 = tpu.matmul %83, %85, %cst_96 {dimension_numbers = #tpu.dot_dimension_numbers<[1], [0], [0], [1], [0, 0, 1, 1], [], []>} : vector<16x128xbf16>, vector<128x128xbf16>, vector<16x128xf32> -> vector<16x128xf32>
    %87 = arith.addf %82, %86 : vector<16x128xf32>
    %c0_97 = arith.constant 0 : index
    %c0_98 = arith.constant 0 : index
    %88 = vector.load %arg5[%c0_97, %c0_98] : memref<1x128xf32, #tpu.memory_space<vmem>>, vector<1x128xf32>
    %89 = vector.broadcast %88 : vector<1x128xf32> to vector<16x128xf32>
    %90 = arith.addf %87, %89 : vector<16x128xf32>
    %91 = arith.addf %90, %50 : vector<16x128xf32>
    %c1_99 = arith.constant 1 : index
    %c0_100 = arith.constant 0 : index
    %c0_101 = arith.constant 0 : index
    %92 = vector.load %arg6[%c1_99, %c0_100, %c0_101] : memref<2x16x128xf32, #tpu.memory_space<vmem>>, vector<1x16x128xf32>
    %93 = vector.shape_cast %92 : vector<1x16x128xf32> to vector<16x128xf32>
    %94 = vector.shape_cast %91 : vector<16x128xf32> to vector<1x16x128xf32>
    tpu.vector_store %arg6[%c1_99, %c0_100, %c0_101], %94 {strides = array<i32>} : memref<2x16x128xf32, #tpu.memory_space<vmem>>, vector<1x16x128xf32>,
    return
  }
  func.func @transform_0(%arg0: i32) -> (i32, i32, i32) {
    %c0_i32 = arith.constant 0 : i32
    %c0_i32_0 = arith.constant 0 : i32
    %c0_i32_1 = arith.constant 0 : i32
    return %arg0, %c0_i32, %c0_i32_0 : i32, i32, i32
  }
  func.func @transform_1(%arg0: i32) -> (i32, i32, i32) {
    %c0_i32 = arith.constant 0 : i32
    %c0_i32_0 = arith.constant 0 : i32
    %c0_i32_1 = arith.constant 0 : i32
    %c0_i32_2 = arith.constant 0 : i32
    return %c0_i32, %c0_i32_0, %c0_i32_1 : i32, i32, i32
  }
  func.func @transform_2(%arg0: i32) -> (i32, i32) {
    %c0_i32 = arith.constant 0 : i32
    %c0_i32_0 = arith.constant 0 : i32
    %c0_i32_1 = arith.constant 0 : i32
    return %c0_i32, %c0_i32_0 : i32, i32
  }
  func.func @transform_3(%arg0: i32) -> (i32, i32, i32) {
    %c0_i32 = arith.constant 0 : i32
    %c0_i32_0 = arith.constant 0 : i32
    %c0_i32_1 = arith.constant 0 : i32
    %c0_i32_2 = arith.constant 0 : i32
    return %c0_i32, %c0_i32_0, %c0_i32_1 : i32, i32, i32
  }
  func.func @transform_4(%arg0: i32) -> (i32, i32) {
    %c0_i32 = arith.constant 0 : i32
    %c0_i32_0 = arith.constant 0 : i32
    %c0_i32_1 = arith.constant 0 : i32
    return %c0_i32, %c0_i32_0 : i32, i32
  }
  func.func @transform_5(%arg0: i32) -> (i32, i32, i32) {
    %c0_i32 = arith.constant 0 : i32
    %c0_i32_0 = arith.constant 0 : i32
    %c0_i32_1 = arith.constant 0 : i32
    return %arg0, %c0_i32, %c0_i32_0 : i32, i32, i32
  }
}

</mosaic_0001>

<bundles_post_ra>
// kernel: tpu_custom_call.1
= control target key start
LH: loop header
LB: loop body
LE: loop exit
PB: predicated region body
PF: predicated region fallthrough
CT: control target
= control target key end

     0   :  { %10 = vsyncpa [#allocation4], 0  ;;  %s2713_s0 = inlined_call_operand.hbm [shape: f32[2,16,128], index: 0, kind: input, shape index: {}]   ;;  %s2714_s1 = inlined_call_operand.hbm [shape: bf16[3,128,128], index: 1, kind: input, shape index: {}]   ;;  %s2715_s2 = inlined_call_operand.vmem [shape: f32[1,128], index: 2, kind: input, shape index: {}]   ;;  %s2716_s3 = inlined_call_operand.hbm [shape: bf16[3,128,128], index: 3, kind: input, shape index: {}]   ;;  %s2717_s4 = inlined_call_operand.vmem [shape: f32[1,128], index: 4, kind: input, shape index: {}]   ;;  %s2718_s5 = inlined_call_operand.hbm [shape: f32[2,16,128], index: 5, kind: output, shape index: {}]  }
   0x1   :  { %11 = vsyncpa [#allocation7], 0 }
   0x2   :  { %12 = vsyncpa [#allocation5], 0  ;;  %s2375_s18 = smov [#allocation6]   ;;  %s2281_s22 = scalar_lea.hbm %s2714_s1, 3072 }
   0x3   :  { %s30_s19 = sshll.u32 %s2375_s18, 4  ;;  %p2282_p0 = scmp.ne.s32.totalorder %s2714_s1, %s2281_s22  ;;  %s31_s19 = int_to_ptr.vmem [resolvable:$true] %s30_s19 }
   0x4   :  { %p2285_p1 = scmp.lt.u32.totalorder %s2281_s22, %s2714_s1 }
   0x6   :  { %p2287_p2 = pnand %p2285_p1, %p2282_p0 }
   0x8   :  { %2290 = shalt.err (!%p2287_p2)
}
   0x9   :  { %s2291_s27 = scalar_lea.vmem %s31_s19, 3072  ;;  %p2296_p4 = scmp.lt.s32.totalorder %s31_s19, %s31_s19 }
   0xa   :  { %p2292_p3 = scmp.ne.s32.totalorder %s31_s19, %s2291_s27  ;;  %p2297_p5 = scmp.lt.s32.totalorder %s2291_s27, %s2291_s27 }
   0xc   :  { %p2298_p6 = por %p2297_p5, %p2296_p4 }
   0xe   :  { %p2299_p7 = pnand %p2298_p6, %p2292_p3 }
  0x10   :  { %2302 = shalt.err (!%p2299_p7)
}
  0x11   :  { %s2376_s28 = smov 64   ;;  %s2377_s29 = smov 4  }
  0x12   :  { %36 = dma.hbm_to_vmem [thread:$0]  %s2714_s1, 3072, %s31_s19, [#allocation7], %s2376_s28, %s2376_s28, %s2377_s29  }
  0x13   :  { %s2378_s7 = smov [#allocation3]   ;;  %s2303_s11 = scalar_lea.hbm %s2713_s0, 512 }
  0x14   :  { %s18_s8 = sshll.u32 %s2378_s7, 4  ;;  %p2304_p8 = scmp.ne.s32.totalorder %s2713_s0, %s2303_s11  ;;  %s19_s8 = int_to_ptr.vmem [resolvable:$true] %s18_s8 }
  0x15   :  { %p2307_p9 = scmp.lt.u32.totalorder %s2303_s11, %s2713_s0 }
  0x17   :  { %p2309_p10 = pnand %p2307_p9, %p2304_p8 }
  0x19   :  { %2312 = shalt.err (!%p2309_p10)
}
  0x1a   :  { %s2313_s16 = scalar_lea.vmem %s19_s8, 512  ;;  %p2318_p12 = scmp.lt.s32.totalorder %s19_s8, %s19_s8 }
  0x1b   :  { %p2314_p11 = scmp.ne.s32.totalorder %s19_s8, %s2313_s16  ;;  %p2319_p13 = scmp.lt.s32.totalorder %s2313_s16, %s2313_s16 }
  0x1d   :  { %p2320_p0 = por %p2319_p13, %p2318_p12 }
  0x1f   :  { %p2321_p1 = pnand %p2320_p0, %p2314_p11 }
  0x21   :  { %2324 = shalt.err (!%p2321_p1)
}
  0x22   :  { %s2379_s1 = smov 128   ;;  %s2380_s17 = smov 8  }
  0x23   :  { %24 = dma.hbm_to_vmem [thread:$0]  %s2713_s0, 512, %s19_s8, [#allocation4], %s2379_s1, %s2379_s1, %s2380_s17  }
  0x24   :  { %s2381_s20 = smov [#allocation8]   ;;  %s2325_s24 = scalar_lea.hbm %s2716_s3, 3072 }
  0x25   :  { %s44_s21 = sshll.u32 %s2381_s20, 4  ;;  %p2326_p2 = scmp.ne.s32.totalorder %s2716_s3, %s2325_s24  ;;  %s45_s21 = int_to_ptr.vmem [resolvable:$true] %s44_s21 }
  0x26   :  { %p2329_p3 = scmp.lt.u32.totalorder %s2325_s24, %s2716_s3 }
  0x28   :  { %p2331_p4 = pnand %p2329_p3, %p2326_p2 }
  0x2a   :  { %2334 = shalt.err (!%p2331_p4)
}
  0x2b   :  { %s2335_s6 = scalar_lea.vmem %s45_s21, 3072  ;;  %p2340_p6 = scmp.lt.s32.totalorder %s45_s21, %s45_s21 }
  0x2c   :  { %p2336_p5 = scmp.ne.s32.totalorder %s45_s21, %s2335_s6  ;;  %p2341_p7 = scmp.lt.s32.totalorder %s2335_s6, %s2335_s6 }
  0x2e   :  { %p2342_p8 = por %p2341_p7, %p2340_p6 }
  0x30   :  { %p2343_p9 = pnand %p2342_p8, %p2336_p5 }
  0x32   :  { %2346 = shalt.err (!%p2343_p9)
}
  0x33   :  { %50 = dma.hbm_to_vmem [thread:$0]  %s2716_s3, 3072, %s45_s21, [#allocation7], %s2376_s28, %s2376_s28, %s2377_s29  }
  0x34   :  { %2369 = dma.done.wait [#allocation4], 512  }
  0x35   :  { %2370 = vsyncadd [#allocation4], 4294966784 }
  0x36   :  { %2371 = dma.done.wait [#allocation7], 6144  }
  0x37   :  { %2372 = vsyncadd [#allocation7], 4294961152  ;;  %v2382_v0 = vmov 0.0   ;;  %vm2383_vm0 = vmmov 0   ;;  %v2172_v1 = vld [vmem:[#allocation6 + $0x40] sm:$0xff]   ;;  %v2174_v3 = vld [vmem:[#allocation6 + $0x48] sm:$0xff]  }
  0x38   :  { %1922 = vmatprep.subr.bf16.mxu0 %v2382_v0  ;;  %1942 = vmatprep.subr.bf16.mxu1 %v2382_v0  ;;  %v2173_v2 = vld [vmem:[#allocation6] sm:$0xff]   ;;  %v2175_v4 = vld [vmem:[#allocation6 + $0x8] sm:$0xff]   ;;  %v2176_v5 = vld [vmem:[#allocation6 + $0x50] sm:$0xff]   ;;  %vm63_vm1 = vcmask 1040384   ;;  %vm64_vm2 = vsmask.f32 256 }
  0x39   :  { %1938 = vmatprep.mubr.msk.bf16.mxu0 %vm2383_vm0, %v2382_v0  ;;  %1958 = vmatprep.mubr.msk.bf16.mxu1 %vm2383_vm0, %v2382_v0  ;;  %v2177_v6 = vld [vmem:[#allocation6 + $0x10] sm:$0xff]   ;;  %vm69_vm3 = vsmask.f32 7938  ;;  %v2178_v7 = vld [vmem:[#allocation6 + $0x58] sm:$0xff]   ;;  %vm2473_vm4 = vmand %vm63_vm1, %vm64_vm2  ;;  %vm82_vm6 = vsmask.f32 4368 }
  0x3a   :  { %1923 = vmatpush3.bf16.msra.mxu0 %v2172_v1  ;;  %1943 = vmatpush3.bf16.msra.mxu1 %v2173_v2  ;;  %v2179_v8 = vld [vmem:[#allocation6 + $0x18] sm:$0xff]   ;;  %vm2478_vm5 = vmand %vm63_vm1, %vm69_vm3  ;;  %v2180_v11 = vld [vmem:[#allocation6 + $0x60] sm:$0xff]   ;;  %vm104_vm7 = vcmask 1043456   ;;  %vm157_vm10 = vsmask.f32 7424  ;;  %vm371_vm11 = vcmask 1046528  }
  0x3b   :  { %1924 = vmatprep.subr.bf16.mxu0 %v2382_v0  ;;  %1944 = vmatprep.subr.bf16.mxu1 %v2382_v0  ;;  %v2181_v12 = vld [vmem:[#allocation6 + $0x20] sm:$0xff]   ;;  %v66_v13 = vld [vmem:[#allocation2] sm:$0x1]  ;;  %v71_v14 = vld [vmem:[#allocation2 + $0x8] sm:$0x1] }
  0x3c   :  { %v74_v15 = vld [vmem:[#allocation3] sm:$0xff]  ;;  %v2182_v16 = vld [vmem:[#allocation6 + $0x68] sm:$0xff]   ;;  %v67_v17 = vsel %vm2473_vm4, 0, %v66_v13  ;;  %v72_v18 = vsel %vm2478_vm5, 0, %v71_v14  ;;  %vm2492_vm8 = vmor %vm64_vm2, %vm82_vm6 }
  0x3d   :  { %v75_v19 = vld [vmem:[#allocation3 + $0x8] sm:$0xff]  ;;  %v1806_v20 = vpack.c.bf16 %v74_v15, %v74_v15  ;;  %68 = vst [vmem:[#allocation2] sm:$0x1] %v67_v17  ;;  %73 = vst [vmem:[#allocation2 + $0x8] sm:$0x1] %v72_v18  ;;  %v2184_v30 = vld [vmem:[#allocation6 + $0x70] sm:$0xff]  }
  0x3e   :  { %1925 = vmatpush3.bf16.msra.mxu0 %v2174_v3  ;;  %1945 = vmatpush3.bf16.msra.mxu1 %v2175_v4  ;;  %v1807_v21 = vpack.c.bf16 %v75_v19, %v75_v19  ;;  %v2183_v22 = vld [vmem:[#allocation6 + $0x28] sm:$0xff]   ;;  %vm2498_vm9 = vmand %vm104_vm7, %vm69_vm3  ;;  %v2185_v32 = vld [vmem:[#allocation6 + $0x30] sm:$0xff]  }
  0x3f   :  { %1926 = vmatprep.subr.bf16.mxu0 %v2382_v0  ;;  %1946 = vmatprep.subr.bf16.mxu1 %v2382_v0  ;;  %v85_v23 = vshrl.u32 %v1806_v20, 16  ;;  %v88_v24 = vshll.u32 %v1806_v20, 16  ;;  %v2186_v35 = vld [vmem:[#allocation6 + $0x78] sm:$0xff]   ;;  %v2190_v57 = vld [vmem:[#allocation6 + $0x80] sm:$0xff]   ;;  %v2191_v60 = vld [vmem:[#allocation6 + $0x88] sm:$0xff]  }
  0x40   :  { %v93_v26 = vshrl.u32 %v1807_v21, 16  ;;  %v96_v27 = vshll.u32 %v1807_v21, 16  ;;  %v2187_v40 = vld [vmem:[#allocation6 + $0x38] sm:$0xff]   ;;  %v2192_v61 = vld [vmem:[#allocation6 + $0x90] sm:$0xff]   ;;  %v2194_v63 = vld [vmem:[#allocation6 + $0xa0] sm:$0xff]  }
  0x41   :  { %v87_v28 = vrot.slane %v85_v23, 7  ;;  %v2193_v62 = vld [vmem:[#allocation6 + $0x98] sm:$0xff]   ;;  %v2195_v1 = vld [vmem:[#allocation6 + $0xa8] sm:$0xff]   ;;  %v2196_v2 = vld [vmem:[#allocation6 + $0xb0] sm:$0xff]  }
  0x42   :  { %1927 = vmatpush3.bf16.msra.mxu0 %v2176_v5  ;;  %1947 = vmatpush3.bf16.msra.mxu1 %v2177_v6  ;;  %v95_v31 = vrot.slane %v93_v26, 7  ;;  %v2197_v3 = vld [vmem:[#allocation6 + $0xb8] sm:$0xff]   ;;  %v2199_v5 = vld [vmem:[#allocation8] sm:$0xff]   ;;  %v2200_v6 = vld [vmem:[#allocation8 + $0x8] sm:$0xff]  }
  0x43   :  { %1928 = vmatprep.subr.bf16.mxu0 %v2382_v0  ;;  %1948 = vmatprep.subr.bf16.mxu1 %v2382_v0  ;;  %v90_v33 = vor.u32 %v88_v24, %v87_v28  ;;  %v91_v34 = vrot.slane %v87_v28, 4  ;;  %v2203_v10 = vld [vmem:[#allocation8 + $0x48] sm:$0xff]   ;;  %v2206_v13 = vld [vmem:[#allocation8 + $0x20] sm:$0xff]   ;;  %v2207_v14 = vld [vmem:[#allocation8 + $0x58] sm:$0xff]  }
  0x44   :  { %v98_v36 = vor.u32 %v96_v27, %v95_v31  ;;  %v100_v37 = vrot.slane %v95_v31, 4  ;;  %v106_v38 = vld [vmem:[#allocation2] sm:$0xf]  ;;  %v110_v39 = vld [vmem:[#allocation2 + $0x8] sm:$0x1]  ;;  %v2208_v15 = vld [vmem:[#allocation8 + $0x28] sm:$0xff]  }
  0x45   :  { %v107_v42 = vsel %vm2498_vm9, %v90_v33, %v106_v38  ;;  %v2210_v17 = vld [vmem:[#allocation8 + $0x30] sm:$0xff]   ;;  %v2211_v18 = vld [vmem:[#allocation8 + $0x68] sm:$0xff]   ;;  %v2212_v19 = vld [vmem:[#allocation8 + $0x38] sm:$0xff]  }
  0x46   :  { %1929 = vmatpush3.bf16.msra.mxu0 %v2178_v7  ;;  %1949 = vmatpush3.bf16.msra.mxu1 %v2179_v8  ;;  %v99_v41 = vsel %vm2492_vm8, %v91_v34, %v98_v36  ;;  %v111_v43 = vsel %vm2473_vm4, %v100_v37, %v110_v39  ;;  %108 = vst [vmem:[#allocation2] sm:$0xf] %v107_v42  ;;  %v2201_v7 = vld [vmem:[#allocation8 + $0x40] sm:$0xff]   ;;  %v2202_v8 = vld [vmem:[#allocation8 + $0x10] sm:$0xff]   ;;  %v2216_v21 = vld [vmem:[#allocation8 + $0x78] sm:$0xff]  }
  0x47   :  { %1930 = vmatprep.subr.bf16.mxu0 %v2382_v0  ;;  %1950 = vmatprep.subr.bf16.mxu1 %v2382_v0  ;;  %109 = vst [vmem:[#allocation2 + $0x4] sm:$0xf] %v99_v41  ;;  %112 = vst [vmem:[#allocation2 + $0x8] sm:$0x1] %v111_v43  ;;  %v2213_v20 = vld [vmem:[#allocation8 + $0x70] sm:$0xff]   ;;  %v2557_v43 = vld [vmem:[#allocation3 + $0x18] sm:$0xff] }
  0x48   :  { %v2555_v42 = vld [vmem:[#allocation3 + $0x10] sm:$0xff]  ;;  %v2271_v9 = vld [vmem:[#allocation8 + $0x88] sm:$0xff]  }
  0x4a   :  { %1931 = vmatpush3.bf16.msra.mxu0 %v2180_v11  ;;  %1951 = vmatpush3.bf16.msra.mxu1 %v2181_v12  ;;  %v2204_v11 = vld [vmem:[#allocation8 + $0x18] sm:$0xff]   ;;  %v2205_v12 = vld [vmem:[#allocation8 + $0x50] sm:$0xff]  }
  0x4b   :  { %1932 = vmatprep.subr.bf16.mxu0 %v2382_v0  ;;  %1952 = vmatprep.subr.bf16.mxu1 %v2382_v0 }
  0x4d   :  { %v2514_v44 = vld [vmem:[#allocation2] sm:$0xf] }
  0x4e   :  { %1933 = vmatpush3.bf16.msra.mxu0 %v2182_v16  ;;  %1953 = vmatpush3.bf16.msra.mxu1 %v2183_v22  ;;  %v114_v45 = vld [vmem:[#allocation2 + $0x4] sm:$0xf]  ;;  %v2189_v47 = vld [vmem:[#allocation2 + $0x8] ss:$0 sps:$4 sm:$0x11]   ;;  %v2209_v16 = vld [vmem:[#allocation8 + $0x60] sm:$0xff]  }
  0x4f   :  { %1934 = vmatprep.subr.bf16.mxu0 %v2382_v0  ;;  %1954 = vmatprep.subr.bf16.mxu1 %v2382_v0  ;;  %v1688_v46 = vcombine.low %v2514_v44, %v114_v45  ;;  %v350_v48 = vld [vmem:[#allocation2] sm:$0xe]  ;;  %v166_v52 = vshll.u32 %v2189_v47, 16  ;;  %v373_v54 = vrot.slane %v2189_v47, 1  ;;  %v1810_v47 = vpack.c.bf16 %v2555_v42, %v2555_v42 }
  0x50   :  { %v1706_v49 = vcombine.low %v350_v48, %v114_v45  ;;  %v1811_v48 = vpack.c.bf16 %v2557_v43, %v2557_v43 }
  0x51   :  { %v159_v50 = vshrl.u32 %v1688_v46, 16  ;;  %v161_v51 = vshll.u32 %v1688_v46, 16  ;;  %v168_v56 = vrot.slane %v166_v52, 1 }
  0x52   :  { %1935 = vmatpush3.bf16.msra.mxu0 %v2184_v30  ;;  %1955 = vmatpush3.bf16.msra.mxu1 %v2185_v32  ;;  %v372_v53 = vrot.slane %v1706_v49, 1 }
  0x53   :  { %1936 = vmatprep.subr.bf16.mxu0 %v2382_v0  ;;  %1956 = vmatprep.subr.bf16.mxu1 %v2382_v0  ;;  %v163_v55 = vrot.slane %v161_v51, 1 }
  0x54   :  { %v374_v4 = vsel %vm371_vm11, %v372_v53, %v373_v54  ;;  %v885_v53 = vshrl.u32 %v1810_v47, 16  ;;  %v893_v54 = vshrl.u32 %v1811_v48, 16 }
  0x55   :  { %v164_v58 = vor.u32 %v163_v55, %v159_v50 }
  0x56   :  { %1937 = vmatpush3.bf16.msra.mxu0 %v2186_v35  ;;  %1957 = vmatpush3.bf16.msra.mxu1 %v2187_v40  ;;  %v2552_v35 = vld [vmem:[%s2715_s2] ss:$0 sm:$0xff] }
  0x57   :  { %1962 = vmatprep.subr.bf16.mxu0 %v2382_v0  ;;  %1982 = vmatprep.subr.bf16.mxu1 %v2382_v0  ;;  %v169_v59 = vsel %vm157_vm10, %v164_v58, %v168_v56 }
  0x59   :  { %1959 = vmatmul.mubr.bf16.vlgmr.msra.gmra.mrb[0].mxu1 %v1688_v46  ;;  %1939 = vmatmul.mubr.bf16.vlgmr.msra.gmra.mrb[0].mxu0 %v169_v59 }
  0x5a   :  { %1998 = vmatprep.mubr.msk.bf16.mxu1 %vm2383_vm0, %v2382_v0  ;;  %1963 = vmatpush3.bf16.msra.mxu0 %v2190_v57 }
  0x5b   :  { %1978 = vmatprep.mubr.msk.bf16.mxu0 %vm2383_vm0, %v2382_v0  ;;  %1964 = vmatprep.subr.bf16.mxu0 %v2382_v0 }
  0x5c   :  { %1983 = vmatpush3.bf16.msra.mxu1 %v2201_v7 }
  0x5d   :  { %1984 = vmatprep.subr.bf16.mxu1 %v2382_v0 }
  0x5e   :  { %1965 = vmatpush3.bf16.msra.mxu0 %v2191_v60 }
  0x5f   :  { %1966 = vmatprep.subr.bf16.mxu0 %v2382_v0 }
  0x60   :  { %1985 = vmatpush3.bf16.msra.mxu1 %v2203_v10 }
  0x61   :  { %1986 = vmatprep.subr.bf16.mxu1 %v2382_v0 }
  0x62   :  { %1967 = vmatpush3.bf16.msra.mxu0 %v2192_v61  ;;  %v507_v61 = vld [vmem:[#allocation2 + $0x8] sm:$0x1] }
  0x63   :  { %1968 = vmatprep.subr.bf16.mxu0 %v2382_v0 }
  0x64   :  { %1987 = vmatpush3.bf16.msra.mxu1 %v2205_v12 }
  0x65   :  { %1988 = vmatprep.subr.bf16.mxu1 %v2382_v0 }
  0x66   :  { %1969 = vmatpush3.bf16.msra.mxu0 %v2193_v62  ;;  %v887_v62 = vrot.slane %v885_v53, 7 }
  0x67   :  { %1970 = vmatprep.subr.bf16.mxu0 %v2382_v0 }
  0x68   :  { %1989 = vmatpush3.bf16.msra.mxu1 %v2207_v14  ;;  %v891_v10 = vrot.slane %v887_v62, 4 }
  0x69   :  { %1990 = vmatprep.subr.bf16.mxu1 %v2382_v0 }
  0x6a   :  { %1971 = vmatpush3.bf16.msra.mxu0 %v2194_v63  ;;  %v895_v63 = vrot.slane %v893_v54, 7  ;;  %v2229_v54 = vld [vmem:[#allocation8 + $0xa8] sm:$0xff]  }
  0x6b   :  { %1972 = vmatprep.subr.bf16.mxu0 %v2382_v0 }
  0x6c   :  { %1991 = vmatpush3.bf16.msra.mxu1 %v2209_v16 }
  0x6d   :  { %1992 = vmatprep.subr.bf16.mxu1 %v2382_v0 }
  0x6e   :  { %1973 = vmatpush3.bf16.msra.mxu0 %v2195_v1  ;;  %v896_v1 = vshll.u32 %v1811_v48, 16  ;;  %v2226_v48 = vld [vmem:[#allocation6 + $0x68] sm:$0xff]  }
  0x6f   :  { %1974 = vmatprep.subr.bf16.mxu0 %v2382_v0 }
  0x70   :  { %1993 = vmatpush3.bf16.msra.mxu1 %v2211_v18  ;;  %v2215_v18 = vld [vmem:[#allocation6 + $0x40] sm:$0xff]  }
  0x71   :  { %1994 = vmatprep.subr.bf16.mxu1 %v2382_v0 }
  0x72   :  { %1975 = vmatpush3.bf16.msra.mxu0 %v2196_v2 }
  0x73   :  { %1976 = vmatprep.subr.bf16.mxu0 %v2382_v0 }
  0x74   :  { %1995 = vmatpush3.bf16.msra.mxu1 %v2213_v20 }
  0x75   :  { %1996 = vmatprep.subr.bf16.mxu1 %v2382_v0 }
  0x76   :  { %1977 = vmatpush3.bf16.msra.mxu0 %v2197_v3 }
  0x77   :  { %2002 = vmatprep.subr.bf16.mxu0 %v2382_v0 }
  0x78   :  { %1997 = vmatpush3.bf16.msra.mxu1 %v2216_v21 }
  0x79   :  { %1979 = vmatmul.mubr.bf16.vlgmr.msra.gmra.mrb[4].mxu0 %v374_v4  ;;  %2022 = vmatprep.subr.bf16.mxu1 %v2382_v0 }
  0x7a   :  { %2018 = vmatprep.mubr.msk.bf16.mxu0 %vm2383_vm0, %v2382_v0  ;;  %2003 = vmatpush3.bf16.msra.mxu0 %v2199_v5 }
  0x7b   :  { %2004 = vmatprep.subr.bf16.mxu0 %v2382_v0 }
  0x7e   :  { %2005 = vmatpush3.bf16.msra.mxu0 %v2200_v6  ;;  %v888_v6 = vshll.u32 %v1810_v47, 16  ;;  %v2225_v47 = vld [vmem:[#allocation8 + $0x98] sm:$0xff]  }
  0x7f   :  { %2006 = vmatprep.subr.bf16.mxu0 %v2382_v0 }
  0x80   :  { %v890_v12 = vor.u32 %v888_v6, %v887_v62  ;;  %v2238_v6 = vld [vmem:[#allocation6 + $0x90] sm:$0xff]  }
  0x82   :  { %2007 = vmatpush3.bf16.msra.mxu0 %v2202_v8 }
  0x83   :  { %2008 = vmatprep.subr.bf16.mxu0 %v2382_v0 }
  0x86   :  { %2009 = vmatpush3.bf16.msra.mxu0 %v2204_v11  ;;  %v898_v11 = vor.u32 %v896_v1, %v895_v63  ;;  %v2235_v1 = vld [vmem:[#allocation8 + $0xb8] sm:$0xff]  }
  0x87   :  { %2010 = vmatprep.subr.bf16.mxu0 %v2382_v0 }
  0x8a   :  { %2011 = vmatpush3.bf16.msra.mxu0 %v2206_v13  ;;  %v900_v13 = vrot.slane %v895_v63, 4 }
  0x8b   :  { %2012 = vmatprep.subr.bf16.mxu0 %v2382_v0 }
  0x8e   :  { %2013 = vmatpush3.bf16.msra.mxu0 %v2208_v15 }
  0x8f   :  { %2014 = vmatprep.subr.bf16.mxu0 %v2382_v0 }
  0x92   :  { %2015 = vmatpush3.bf16.msra.mxu0 %v2210_v17 }
  0x93   :  { %2016 = vmatprep.subr.bf16.mxu0 %v2382_v0 }
  0x96   :  { %2017 = vmatpush3.bf16.msra.mxu0 %v2212_v19 }
  0x97   :  { %2042 = vmatprep.subr.bf16.mxu0 %v2382_v0 }
 0x12c   :  { %v343_v22 = vpop.f32.mrb[0].mxu1  ;;  %v253_v27 = vpop.f32.mrb[0].mxu0 }
 0x12d   :  { %v1960_v23 = vpop.f32.mrb[1].mxu1  ;;  %v344_v28 = vadd.f32 %v343_v22, %v253_v27  ;;  %v1940_v30 = vpop.f32.mrb[1].mxu0  ;;  %v2217_v27 = vld [vmem:[#allocation6 + $0x48] sm:$0xff]  }
 0x12e   :  { %v346_v24 = vpop.f32.mrb[2].mxu1  ;;  %v256_v31 = vpop.f32.mrb[2].mxu0 }
 0x12f   :  { %v1961_v26 = vpop.f32.mrb[3].mxu1  ;;  %v347_v32 = vadd.f32 %v346_v24, %v256_v31  ;;  %v1941_v33 = vpop.f32.mrb[3].mxu0 }
 0x130   :  { %v2219_v33 = vld [vmem:[#allocation8 + $0x80] sm:$0xff]  }
 0x14c   :  { %v458_v34 = vpop.f32.mrb[4].mxu0 }
 0x14d   :  { %v465_v36 = vadd.f32 %v458_v34, %v344_v28  ;;  %v1980_v37 = vpop.f32.mrb[5].mxu0  ;;  %v2220_v34 = vld [vmem:[#allocation6 + $0x50] sm:$0xff]  }
 0x14e   :  { %v461_v38 = vpop.f32.mrb[6].mxu0  ;;  %v2221_v37 = vld [vmem:[#allocation8 + $0x88] sm:$0xff]  }
 0x14f   :  { %v474_v39 = vadd.f32 %v2552_v35, %v465_v36  ;;  %v466_v40 = vadd.f32 %v461_v38, %v347_v32  ;;  %v1981_v41 = vpop.f32.mrb[7].mxu0  ;;  %v2222_v38 = vld [vmem:[#allocation6 + $0x58] sm:$0xff]  }
 0x151   :  { %v476_v45 = vmax.f32 %v474_v39, 0.0  ;;  %v475_v46 = vadd.f32 %v2552_v35, %v466_v40  ;;  %v2223_v39 = vld [vmem:[#allocation8 + $0x90] sm:$0xff]  }
 0x153   :  { %v1808_v49 = vpack.c.bf16 %v476_v45, %v476_v45  ;;  %v477_v50 = vmax.f32 %v475_v46, 0.0  ;;  %v2224_v45 = vld [vmem:[#allocation6 + $0x60] sm:$0xff]  }
 0x155   :  { %v485_v51 = vshrl.u32 %v1808_v49, 16  ;;  %v1809_v52 = vpack.c.bf16 %v477_v50, %v477_v50  ;;  %v488_v56 = vshll.u32 %v1808_v49, 16  ;;  %v2227_v50 = vld [vmem:[#allocation8 + $0xa0] sm:$0xff]  }
 0x157   :  { %v487_v55 = vrot.slane %v485_v51, 7  ;;  %v493_v57 = vshrl.u32 %v1809_v52, 16  ;;  %v496_v60 = vshll.u32 %v1809_v52, 16  ;;  %v2228_v51 = vld [vmem:[#allocation6 + $0x70] sm:$0xff]  }
 0x159   :  { %v490_v58 = vor.u32 %v488_v56, %v487_v55  ;;  %v495_v59 = vrot.slane %v493_v57, 7  ;;  %v491_v2 = vrot.slane %v487_v55, 4  ;;  %v2230_v55 = vld [vmem:[#allocation6 + $0x78] sm:$0xff]  }
 0x15b   :  { %v504_v3 = vsel %vm2498_vm9, %v490_v58, %v2514_v44  ;;  %v498_v4 = vor.u32 %v496_v60, %v495_v59  ;;  %v500_v5 = vrot.slane %v495_v59, 4  ;;  %v899_v44 = vsel %vm2492_vm8, %v891_v10, %v898_v11  ;;  %v2231_v59 = vld [vmem:[#allocation8 + $0xb0] sm:$0xff]   ;;  %v2240_v10 = vld [vmem:[#allocation6 + $0x98] sm:$0xff]  }
 0x15c   :  { %505 = vst [vmem:[#allocation2] sm:$0xf] %v504_v3  ;;  %v2241_v11 = vld [vmem:[#allocation6 + $0x10] sm:$0xff]  }
 0x15d   :  { %v499_v7 = vsel %vm2492_vm8, %v491_v2, %v498_v4  ;;  %v508_v8 = vsel %vm2473_vm4, %v500_v5, %v507_v61  ;;  %v2234_v61 = vld [vmem:[#allocation6 + $0x80] sm:$0xff]   ;;  %v2236_v2 = vld [vmem:[#allocation6 + $0x88] sm:$0xff]  }
 0x15e   :  { %506 = vst [vmem:[#allocation2 + $0x4] sm:$0xf] %v499_v7  ;;  %509 = vst [vmem:[#allocation2 + $0x8] sm:$0x1] %v508_v8  ;;  %v2237_v5 = vld [vmem:[#allocation6] sm:$0xff]   ;;  %v2239_v8 = vld [vmem:[#allocation6 + $0x8] sm:$0xff]  }
 0x163   :  { %v2571_v14 = vld [vmem:[#allocation2] sm:$0xe] }
 0x164   :  { %v510_v15 = vld [vmem:[#allocation2] sm:$0xf] }
 0x165   :  { %v904_v16 = vld [vmem:[#allocation2] sm:$0xf]  ;;  %v2577_v19 = vld [vmem:[#allocation2 + $0x4] sm:$0xf]  ;;  %v908_v20 = vld [vmem:[#allocation2 + $0x8] sm:$0x1] }
 0x166   :  { %v905_v17 = vsel %vm2498_vm9, %v890_v12, %v904_v16  ;;  %v1718_v21 = vcombine.low %v510_v15, %v2577_v19  ;;  %907 = vst [vmem:[#allocation2 + $0x4] sm:$0xf] %v899_v44  ;;  %v909_v22 = vsel %vm2473_vm4, %v900_v13, %v908_v20  ;;  %v2582_v23 = vld [vmem:[#allocation2 + $0x8] ss:$0 sps:$4 sm:$0x11]   ;;  %v1736_v62 = vcombine.low %v2571_v14, %v2577_v19  ;;  %v2242_v12 = vld [vmem:[#allocation6 + $0xa0] sm:$0xff]  }
 0x167   :  { %906 = vst [vmem:[#allocation2] sm:$0xf] %v905_v17  ;;  %910 = vst [vmem:[#allocation2 + $0x8] sm:$0x1] %v909_v22  ;;  %v562_v26 = vshll.u32 %v2582_v23, 16  ;;  %v768_v4 = vrot.slane %v2582_v23, 1 }
 0x168   :  { %2019 = vmatmul.mubr.bf16.vlgmr.msra.gmra.mrb[8].mxu0 %v1718_v21  ;;  %v557_v24 = vshll.u32 %v1718_v21, 16  ;;  %v555_v28 = vshrl.u32 %v1718_v21, 16  ;;  %v767_v3 = vrot.slane %v1736_v62, 1  ;;  %v2243_v13 = vld [vmem:[#allocation6 + $0x18] sm:$0xff]   ;;  %v2244_v14 = vld [vmem:[#allocation6 + $0xa8] sm:$0xff]   ;;  %v2245_v15 = vld [vmem:[#allocation6 + $0x20] sm:$0xff]  }
 0x169   :  { %2043 = vmatpush3.bf16.msra.mxu0 %v2215_v18  ;;  %2058 = vmatprep.mubr.msk.bf16.mxu0 %vm2383_vm0, %v2382_v0  ;;  %v564_v32 = vrot.slane %v562_v26, 1  ;;  %v2246_v16 = vld [vmem:[#allocation6 + $0xb0] sm:$0xff]   ;;  %v2247_v18 = vld [vmem:[#allocation6 + $0x28] sm:$0xff]   ;;  %v2248_v19 = vld [vmem:[#allocation6 + $0xb8] sm:$0xff]  }
 0x16a   :  { %2044 = vmatprep.subr.bf16.mxu0 %v2382_v0  ;;  %v559_v30 = vrot.slane %v557_v24, 1  ;;  %v769_v7 = vsel %vm371_vm11, %v767_v3, %v768_v4  ;;  %v2249_v22 = vld [vmem:[#allocation6 + $0x30] sm:$0xff]   ;;  %v2251_v24 = vld [vmem:[#allocation6 + $0x38] sm:$0xff]   ;;  %v2252_v26 = vld [vmem:[#allocation8] sm:$0xff]  }
 0x16c   :  { %v560_v31 = vor.u32 %v559_v30, %v555_v28  ;;  %v2254_v28 = vld [vmem:[#allocation8 + $0x40] sm:$0xff]   ;;  %v2255_v30 = vld [vmem:[#allocation8 + $0x10] sm:$0xff]  }
 0x16d   :  { %2045 = vmatpush3.bf16.msra.mxu0 %v2217_v27  ;;  %v2596_v41 = vld [vmem:[#allocation2 + $0x4] sm:$0xf]  ;;  %v2253_v27 = vld [vmem:[#allocation8 + $0x8] sm:$0xff]  }
 0x16e   :  { %v565_v36 = vsel %vm157_vm10, %v560_v31, %v564_v32  ;;  %2046 = vmatprep.subr.bf16.mxu0 %v2382_v0  ;;  %v2594_v40 = vld [vmem:[#allocation2] sm:$0xf]  ;;  %v2608_v52 = vld [vmem:[#allocation2 + $0x8] ss:$0 sps:$4 sm:$0x11]   ;;  %v2256_v31 = vld [vmem:[#allocation8 + $0x48] sm:$0xff]  }
 0x16f   :  { %1999 = vmatmul.mubr.bf16.vlgmr.msra.gmra.mrb[4].mxu1 %v565_v36  ;;  %v2602_v46 = vcombine.low %v2594_v40, %v2596_v41  ;;  %v962_v57 = vshll.u32 %v2608_v52, 16  ;;  %v1146_v44 = vld [vmem:[#allocation2] sm:$0xe]  ;;  %v1167_v21 = vrot.slane %v2608_v52, 1  ;;  %v2257_v32 = vld [vmem:[#allocation8 + $0x18] sm:$0xff]  }
 0x170   :  { %2023 = vmatpush3.bf16.msra.mxu1 %v2219_v33  ;;  %2038 = vmatprep.mubr.msk.bf16.mxu1 %vm2383_vm0, %v2382_v0  ;;  %v1766_v17 = vcombine.low %v1146_v44, %v2596_v41  ;;  %v2258_v33 = vld [vmem:[#allocation8 + $0x50] sm:$0xff]   ;;  %v2260_v36 = vld [vmem:[#allocation8 + $0x58] sm:$0xff]   ;;  %v2264_v41 = vld [vmem:[#allocation8 + $0x68] sm:$0xff]  }
 0x171   :  { %2047 = vmatpush3.bf16.msra.mxu0 %v2220_v34  ;;  %2024 = vmatprep.subr.bf16.mxu1 %v2382_v0  ;;  %v957_v49 = vshll.u32 %v2602_v46, 16  ;;  %v955_v56 = vshrl.u32 %v2602_v46, 16  ;;  %v964_v60 = vrot.slane %v962_v57, 1  ;;  %v2259_v34 = vld [vmem:[#allocation8 + $0x20] sm:$0xff]  }
 0x172   :  { %2048 = vmatprep.subr.bf16.mxu0 %v2382_v0  ;;  %v1166_v20 = vrot.slane %v1766_v17, 1 }
 0x173   :  { %v959_v53 = vrot.slane %v957_v49, 1 }
 0x174   :  { %2025 = vmatpush3.bf16.msra.mxu1 %v2221_v37  ;;  %v1168_v23 = vsel %vm371_vm11, %v1166_v20, %v1167_v21  ;;  %v2261_v37 = vld [vmem:[#allocation8 + $0x28] sm:$0xff]  }
 0x175   :  { %2049 = vmatpush3.bf16.msra.mxu0 %v2222_v38  ;;  %2026 = vmatprep.subr.bf16.mxu1 %v2382_v0  ;;  %v960_v58 = vor.u32 %v959_v53, %v955_v56  ;;  %v2262_v38 = vld [vmem:[#allocation8 + $0x60] sm:$0xff]  }
 0x176   :  { %2050 = vmatprep.subr.bf16.mxu0 %v2382_v0 }
 0x177   :  { %v965_v63 = vsel %vm157_vm10, %v960_v58, %v964_v60 }
 0x178   :  { %2027 = vmatpush3.bf16.msra.mxu1 %v2223_v39  ;;  %v2263_v39 = vld [vmem:[#allocation8 + $0x30] sm:$0xff]  }
 0x179   :  { %2051 = vmatpush3.bf16.msra.mxu0 %v2224_v45  ;;  %2028 = vmatprep.subr.bf16.mxu1 %v2382_v0  ;;  %v2265_v45 = vld [vmem:[#allocation8 + $0x38] sm:$0xff]  }
 0x17a   :  { %2052 = vmatprep.subr.bf16.mxu0 %v2382_v0 }
 0x17c   :  { %2029 = vmatpush3.bf16.msra.mxu1 %v2225_v47  ;;  %v2268_v47 = vld [vmem:[#allocation8 + $0x78] sm:$0xff]  }
 0x17d   :  { %2053 = vmatpush3.bf16.msra.mxu0 %v2226_v48  ;;  %2030 = vmatprep.subr.bf16.mxu1 %v2382_v0 }
 0x17e   :  { %2054 = vmatprep.subr.bf16.mxu0 %v2382_v0 }
 0x180   :  { %2031 = vmatpush3.bf16.msra.mxu1 %v2227_v50 }
 0x181   :  { %2055 = vmatpush3.bf16.msra.mxu0 %v2228_v51  ;;  %2032 = vmatprep.subr.bf16.mxu1 %v2382_v0 }
 0x182   :  { %2056 = vmatprep.subr.bf16.mxu0 %v2382_v0 }
 0x184   :  { %2033 = vmatpush3.bf16.msra.mxu1 %v2229_v54 }
 0x185   :  { %2057 = vmatpush3.bf16.msra.mxu0 %v2230_v55  ;;  %2034 = vmatprep.subr.bf16.mxu1 %v2382_v0 }
 0x186   :  { %2082 = vmatprep.subr.bf16.mxu0 %v2382_v0 }
 0x188   :  { %2035 = vmatpush3.bf16.msra.mxu1 %v2231_v59  ;;  %2059 = vmatmul.mubr.bf16.vlgmr.msra.gmra.mrb[12].mxu0 %v965_v63  ;;  %v2670_v63 = vld [vmem:[%s2717_s4] ss:$0 sm:$0xff]  ;;  %s2384_s4 = smov [#allocation9]  }
 0x189   :  { %2083 = vmatpush3.bf16.msra.mxu0 %v2234_v61  ;;  %2036 = vmatprep.subr.bf16.mxu1 %v2382_v0  ;;  %s1673_s8 = sshll.u32 %s2384_s4, 4  ;;  %s1674_s8 = int_to_ptr.vmem [resolvable:$true] %s1673_s8 }
 0x18a   :  { %2084 = vmatprep.subr.bf16.mxu0 %v2382_v0  ;;  %2098 = vmatprep.mubr.msk.bf16.mxu0 %vm2383_vm0, %v2382_v0  ;;  %s2347_s9 = scalar_lea.vmem %s1674_s8, 512  ;;  %p2352_p11 = scmp.lt.s32.totalorder %s1674_s8, %s1674_s8 }
 0x18b   :  { %p2348_p10 = scmp.ne.s32.totalorder %s1674_s8, %s2347_s9  ;;  %p2353_p12 = scmp.lt.s32.totalorder %s2347_s9, %s2347_s9 }
 0x18c   :  { %2037 = vmatpush3.bf16.msra.mxu1 %v2235_v1 }
 0x18d   :  { %2085 = vmatpush3.bf16.msra.mxu0 %v2236_v2  ;;  %2062 = vmatprep.subr.bf16.mxu1 %v2382_v0  ;;  %p2354_p13 = por %p2353_p12, %p2352_p11 }
 0x18e   :  { %2086 = vmatprep.subr.bf16.mxu0 %v2382_v0 }
 0x18f   :  { %2039 = vmatmul.mubr.bf16.vlgmr.msra.gmra.mrb[8].mxu1 %v769_v7  ;;  %v2279_v7 = vld [vmem:[#allocation3] sm:$0xff]  ;;  %p2355_p0 = pnand %p2354_p13, %p2348_p10 }
 0x190   :  { %2063 = vmatpush3.bf16.msra.mxu1 %v2237_v5  ;;  %2078 = vmatprep.mubr.msk.bf16.mxu1 %vm2383_vm0, %v2382_v0 }
 0x191   :  { %2087 = vmatpush3.bf16.msra.mxu0 %v2238_v6  ;;  %2064 = vmatprep.subr.bf16.mxu1 %v2382_v0 }
 0x192   :  { %2088 = vmatprep.subr.bf16.mxu0 %v2382_v0 }
 0x194   :  { %2065 = vmatpush3.bf16.msra.mxu1 %v2239_v8 }
 0x195   :  { %2089 = vmatpush3.bf16.msra.mxu0 %v2240_v10  ;;  %2066 = vmatprep.subr.bf16.mxu1 %v2382_v0 }
 0x196   :  { %2090 = vmatprep.subr.bf16.mxu0 %v2382_v0 }
 0x198   :  { %2067 = vmatpush3.bf16.msra.mxu1 %v2241_v11  ;;  %v2280_v11 = vld [vmem:[#allocation3 + $0x8] sm:$0xff] }
 0x199   :  { %2091 = vmatpush3.bf16.msra.mxu0 %v2242_v12  ;;  %2068 = vmatprep.subr.bf16.mxu1 %v2382_v0 }
 0x19a   :  { %2092 = vmatprep.subr.bf16.mxu0 %v2382_v0 }
 0x19c   :  { %2069 = vmatpush3.bf16.msra.mxu1 %v2243_v13 }
 0x19d   :  { %2093 = vmatpush3.bf16.msra.mxu0 %v2244_v14  ;;  %2070 = vmatprep.subr.bf16.mxu1 %v2382_v0 }
 0x19e   :  { %2094 = vmatprep.subr.bf16.mxu0 %v2382_v0 }
 0x1a0   :  { %2071 = vmatpush3.bf16.msra.mxu1 %v2245_v15 }
 0x1a1   :  { %2095 = vmatpush3.bf16.msra.mxu0 %v2246_v16  ;;  %2072 = vmatprep.subr.bf16.mxu1 %v2382_v0 }
 0x1a2   :  { %2096 = vmatprep.subr.bf16.mxu0 %v2382_v0 }
 0x1a4   :  { %2073 = vmatpush3.bf16.msra.mxu1 %v2247_v18 }
 0x1a5   :  { %2097 = vmatpush3.bf16.msra.mxu0 %v2248_v19  ;;  %2074 = vmatprep.subr.bf16.mxu1 %v2382_v0 }
 0x1a6   :  { %2122 = vmatprep.subr.bf16.mxu0 %v2382_v0 }
 0x1a8   :  { %2075 = vmatpush3.bf16.msra.mxu1 %v2249_v22  ;;  %2099 = vmatmul.mubr.bf16.vlgmr.msra.gmra.mrb[16].mxu0 %v1168_v23 }
 0x1a9   :  { %2076 = vmatprep.subr.bf16.mxu1 %v2382_v0  ;;  %2138 = vmatprep.mubr.msk.bf16.mxu0 %vm2383_vm0, %v2382_v0 }
 0x1aa   :  { %2123 = vmatpush3.bf16.msra.mxu0 %v2252_v26 }
 0x1ab   :  { %2124 = vmatprep.subr.bf16.mxu0 %v2382_v0 }
 0x1ac   :  { %2077 = vmatpush3.bf16.msra.mxu1 %v2251_v24 }
 0x1ad   :  { %2102 = vmatprep.subr.bf16.mxu1 %v2382_v0 }
 0x1ae   :  { %2125 = vmatpush3.bf16.msra.mxu0 %v2253_v27 }
 0x1af   :  { %2079 = vmatmul.mubr.bf16.vlgmr.msra.gmra.mrb[12].mxu1 %v2602_v46  ;;  %2126 = vmatprep.subr.bf16.mxu0 %v2382_v0  ;;  %v2266_v46 = vld [vmem:[#allocation8 + $0x70] sm:$0xff]  }
 0x1b0   :  { %2118 = vmatprep.mubr.msk.bf16.mxu1 %vm2383_vm0, %v2382_v0  ;;  %2103 = vmatpush3.bf16.msra.mxu1 %v2254_v28 }
 0x1b1   :  { %2104 = vmatprep.subr.bf16.mxu1 %v2382_v0 }
 0x1b2   :  { %2127 = vmatpush3.bf16.msra.mxu0 %v2255_v30 }
 0x1b3   :  { %2128 = vmatprep.subr.bf16.mxu0 %v2382_v0 }
 0x1b4   :  { %2105 = vmatpush3.bf16.msra.mxu1 %v2256_v31 }
 0x1b5   :  { %2106 = vmatprep.subr.bf16.mxu1 %v2382_v0 }
 0x1b6   :  { %2129 = vmatpush3.bf16.msra.mxu0 %v2257_v32 }
 0x1b7   :  { %2130 = vmatprep.subr.bf16.mxu0 %v2382_v0 }
 0x1b8   :  { %2107 = vmatpush3.bf16.msra.mxu1 %v2258_v33 }
 0x1b9   :  { %2108 = vmatprep.subr.bf16.mxu1 %v2382_v0 }
 0x1ba   :  { %2131 = vmatpush3.bf16.msra.mxu0 %v2259_v34 }
 0x1bb   :  { %2132 = vmatprep.subr.bf16.mxu0 %v2382_v0 }
 0x1bc   :  { %2109 = vmatpush3.bf16.msra.mxu1 %v2260_v36 }
 0x1bd   :  { %2110 = vmatprep.subr.bf16.mxu1 %v2382_v0 }
 0x1be   :  { %2133 = vmatpush3.bf16.msra.mxu0 %v2261_v37 }
 0x1bf   :  { %2134 = vmatprep.subr.bf16.mxu0 %v2382_v0 }
 0x1c0   :  { %2111 = vmatpush3.bf16.msra.mxu1 %v2262_v38 }
 0x1c1   :  { %2112 = vmatprep.subr.bf16.mxu1 %v2382_v0 }
 0x1c2   :  { %2135 = vmatpush3.bf16.msra.mxu0 %v2263_v39 }
 0x1c3   :  { %2136 = vmatprep.subr.bf16.mxu0 %v2382_v0 }
 0x1c4   :  { %2113 = vmatpush3.bf16.msra.mxu1 %v2264_v41 }
 0x1c5   :  { %2114 = vmatprep.subr.bf16.mxu1 %v2382_v0 }
 0x1c6   :  { %2137 = vmatpush3.bf16.msra.mxu0 %v2265_v45 }
 0x1c8   :  { %2115 = vmatpush3.bf16.msra.mxu1 %v2266_v46 }
 0x1c9   :  { %2116 = vmatprep.subr.bf16.mxu1 %v2382_v0 }
 0x1cc   :  { %2117 = vmatpush3.bf16.msra.mxu1 %v2268_v47 }
 0x1cd   :  { %2142 = vmatprep.subr.bf16.mxu1 %v2382_v0 }
 0x23b   :  { %v739_v48 = vpop.f32.mrb[8].mxu0 }
 0x23c   :  { %v2020_v49 = vpop.f32.mrb[9].mxu0 }
 0x23d   :  { %v742_v50 = vpop.f32.mrb[10].mxu0 }
 0x23e   :  { %v2021_v51 = vpop.f32.mrb[11].mxu0 }
 0x242   :  { %v649_v52 = vpop.f32.mrb[4].mxu1 }
 0x243   :  { %v740_v53 = vadd.f32 %v739_v48, %v649_v52  ;;  %v2000_v54 = vpop.f32.mrb[5].mxu1  ;;  %v1301_v48 = vld [vmem:[#allocation2 + $0x8] sm:$0x1] }
 0x244   :  { %v652_v55 = vpop.f32.mrb[6].mxu1 }
 0x245   :  { %v743_v56 = vadd.f32 %v742_v50, %v652_v55  ;;  %v2001_v57 = vpop.f32.mrb[7].mxu1 }
 0x25b   :  { %v1049_v58 = vpop.f32.mrb[12].mxu0 }
 0x25c   :  { %v2060_v59 = vpop.f32.mrb[13].mxu0 }
 0x25d   :  { %v1052_v60 = vpop.f32.mrb[14].mxu0  ;;  %v2272_v59 = vld [vmem:[#allocation8 + $0x90] sm:$0xff]  }
 0x25e   :  { %v2061_v61 = vpop.f32.mrb[15].mxu0 }
 0x25f   :  { %v2274_v61 = vld [vmem:[#allocation8 + $0xa0] sm:$0xff]  }
 0x262   :  { %v853_v62 = vpop.f32.mrb[8].mxu1 }
 0x263   :  { %v860_v1 = vadd.f32 %v853_v62, %v740_v53  ;;  %v2040_v2 = vpop.f32.mrb[9].mxu1  ;;  %v2275_v62 = vld [vmem:[#allocation8 + $0xa8] sm:$0xff]  }
 0x264   :  { %v856_v3 = vpop.f32.mrb[10].mxu1 }
 0x265   :  { %v869_v4 = vadd.f32 %v2670_v63, %v860_v1  ;;  %v861_v5 = vadd.f32 %v856_v3, %v743_v56  ;;  %v2041_v6 = vpop.f32.mrb[11].mxu1  ;;  %v2276_v1 = vld [vmem:[#allocation8 + $0xb0] sm:$0xff]  }
 0x267   :  { %v871_v8 = vadd.f32 %v2279_v7, %v869_v4  ;;  %v870_v10 = vadd.f32 %v2670_v63, %v861_v5  ;;  %v2277_v4 = vld [vmem:[#allocation8 + $0xb8] sm:$0xff]  }
 0x269   :  { %873 = vst [vmem:[#allocation9] sm:$0xff] %v871_v8  ;;  %v872_v12 = vadd.f32 %v2280_v11, %v870_v10 }
 0x26b   :  { %874 = vst [vmem:[#allocation9 + $0x8] sm:$0xff] %v872_v12 }
 0x27b   :  { %v1252_v13 = vpop.f32.mrb[16].mxu0 }
 0x27c   :  { %v2100_v14 = vpop.f32.mrb[17].mxu0 }
 0x27d   :  { %v1255_v15 = vpop.f32.mrb[18].mxu0 }
 0x27e   :  { %v2101_v44 = vpop.f32.mrb[19].mxu0 }
 0x282   :  { %v1139_v16 = vpop.f32.mrb[12].mxu1 }
 0x283   :  { %v1140_v17 = vadd.f32 %v1139_v16, %v1049_v58  ;;  %v2080_v18 = vpop.f32.mrb[13].mxu1  ;;  %v2270_v58 = vld [vmem:[#allocation8 + $0x80] sm:$0xff]  }
 0x284   :  { %v1142_v19 = vpop.f32.mrb[14].mxu1 }
 0x285   :  { %v1259_v20 = vadd.f32 %v1252_v13, %v1140_v17  ;;  %v1143_v21 = vadd.f32 %v1142_v19, %v1052_v60  ;;  %v2081_v22 = vpop.f32.mrb[15].mxu1  ;;  %v2273_v60 = vld [vmem:[#allocation8 + $0x98] sm:$0xff]  }
 0x287   :  { %v1268_v23 = vadd.f32 %v2552_v35, %v1259_v20  ;;  %v1260_v24 = vadd.f32 %v1255_v15, %v1143_v21 }
 0x289   :  { %v1270_v26 = vmax.f32 %v1268_v23, 0.0  ;;  %v1269_v27 = vadd.f32 %v2552_v35, %v1260_v24 }
 0x28b   :  { %v1812_v28 = vpack.c.bf16 %v1270_v26, %v1270_v26  ;;  %v1271_v30 = vmax.f32 %v1269_v27, 0.0 }
 0x28d   :  { %v1279_v31 = vshrl.u32 %v1812_v28, 16  ;;  %v1813_v32 = vpack.c.bf16 %v1271_v30, %v1271_v30  ;;  %v1282_v34 = vshll.u32 %v1812_v28, 16 }
 0x28f   :  { %v1281_v33 = vrot.slane %v1279_v31, 7  ;;  %v1287_v36 = vshrl.u32 %v1813_v32, 16  ;;  %v1290_v39 = vshll.u32 %v1813_v32, 16 }
 0x291   :  { %v1284_v37 = vor.u32 %v1282_v34, %v1281_v33  ;;  %v1289_v38 = vrot.slane %v1287_v36, 7  ;;  %v1285_v41 = vrot.slane %v1281_v33, 4 }
 0x293   :  { %v1298_v45 = vsel %vm2498_vm9, %v1284_v37, %v2594_v40  ;;  %v1292_v46 = vor.u32 %v1290_v39, %v1289_v38  ;;  %v1294_v47 = vrot.slane %v1289_v38, 4 }
 0x294   :  { %1299 = vst [vmem:[#allocation2] sm:$0xf] %v1298_v45 }
 0x295   :  { %v1293_v35 = vsel %vm2492_vm8, %v1285_v41, %v1292_v46  ;;  %v1302_v49 = vsel %vm2473_vm4, %v1294_v47, %v1301_v48 }
 0x296   :  { %1300 = vst [vmem:[#allocation2 + $0x4] sm:$0xf] %v1293_v35  ;;  %1303 = vst [vmem:[#allocation2 + $0x8] sm:$0x1] %v1302_v49 }
 0x29b   :  { %v1304_v50 = vld [vmem:[#allocation2] sm:$0xf] }
 0x29c   :  { %v1539_v2 = vld [vmem:[#allocation2] sm:$0xe] }
 0x29d   :  { %v1305_v51 = vld [vmem:[#allocation2 + $0x4] sm:$0xf]  ;;  %v2269_v53 = vld [vmem:[#allocation2 + $0x8] ss:$0 sps:$4 sm:$0x11]  }
 0x29e   :  { %v1778_v52 = vcombine.low %v1304_v50, %v1305_v51  ;;  %v1355_v29 = vshll.u32 %v2269_v53, 16  ;;  %v1796_v3 = vcombine.low %v1539_v2, %v1305_v51  ;;  %v1560_v6 = vrot.slane %v2269_v53, 1 }
 0x2a0   :  { %2139 = vmatmul.mubr.bf16.vlgmr.msra.gmra.mrb[20].mxu0 %v1778_v52  ;;  %v1350_v54 = vshll.u32 %v1778_v52, 16  ;;  %v1348_v40 = vshrl.u32 %v1778_v52, 16  ;;  %v1357_v57 = vrot.slane %v1355_v29, 1  ;;  %v1559_v5 = vrot.slane %v1796_v3, 1 }
 0x2a2   :  { %v1352_v55 = vrot.slane %v1350_v54, 1  ;;  %v1561_v7 = vsel %vm371_vm11, %v1559_v5, %v1560_v6 }
 0x2a4   :  { %v1353_v56 = vor.u32 %v1352_v55, %v1348_v40 }
 0x2a6   :  { %v1358_v25 = vsel %vm157_vm10, %v1353_v56, %v1357_v57 }
 0x2a7   :  { %2119 = vmatmul.mubr.bf16.vlgmr.msra.gmra.mrb[16].mxu1 %v1358_v25 }
 0x2a8   :  { %2143 = vmatpush3.bf16.msra.mxu1 %v2270_v58  ;;  %2158 = vmatprep.mubr.msk.bf16.mxu1 %vm2383_vm0, %v2382_v0 }
 0x2a9   :  { %2144 = vmatprep.subr.bf16.mxu1 %v2382_v0 }
 0x2ac   :  { %2145 = vmatpush3.bf16.msra.mxu1 %v2271_v9 }
 0x2ad   :  { %2146 = vmatprep.subr.bf16.mxu1 %v2382_v0 }
 0x2b0   :  { %2147 = vmatpush3.bf16.msra.mxu1 %v2272_v59 }
 0x2b1   :  { %2148 = vmatprep.subr.bf16.mxu1 %v2382_v0 }
 0x2b4   :  { %2149 = vmatpush3.bf16.msra.mxu1 %v2273_v60 }
 0x2b5   :  { %2150 = vmatprep.subr.bf16.mxu1 %v2382_v0 }
 0x2b8   :  { %2151 = vmatpush3.bf16.msra.mxu1 %v2274_v61 }
 0x2b9   :  { %2152 = vmatprep.subr.bf16.mxu1 %v2382_v0 }
 0x2bc   :  { %2153 = vmatpush3.bf16.msra.mxu1 %v2275_v62 }
 0x2bd   :  { %2154 = vmatprep.subr.bf16.mxu1 %v2382_v0 }
 0x2c0   :  { %2155 = vmatpush3.bf16.msra.mxu1 %v2276_v1 }
 0x2c1   :  { %2156 = vmatprep.subr.bf16.mxu1 %v2382_v0 }
 0x2c4   :  { %2157 = vmatpush3.bf16.msra.mxu1 %v2277_v4 }
 0x2c7   :  { %2159 = vmatmul.mubr.bf16.vlgmr.msra.gmra.mrb[20].mxu1 %v1561_v7 }
 0x373   :  { %v1532_v8 = vpop.f32.mrb[20].mxu0 }
 0x374   :  { %v2140_v10 = vpop.f32.mrb[21].mxu0 }
 0x375   :  { %v1535_v11 = vpop.f32.mrb[22].mxu0 }
 0x376   :  { %v2141_v12 = vpop.f32.mrb[23].mxu0 }
 0x37a   :  { %v1442_v13 = vpop.f32.mrb[16].mxu1 }
 0x37b   :  { %v1533_v14 = vadd.f32 %v1532_v8, %v1442_v13  ;;  %v2120_v15 = vpop.f32.mrb[17].mxu1 }
 0x37c   :  { %v1445_v44 = vpop.f32.mrb[18].mxu1 }
 0x37d   :  { %v1536_v16 = vadd.f32 %v1535_v11, %v1445_v44  ;;  %v2121_v17 = vpop.f32.mrb[19].mxu1 }
 0x39a   :  { %v1645_v18 = vpop.f32.mrb[20].mxu1 }
 0x39b   :  { %v1652_v19 = vadd.f32 %v1645_v18, %v1533_v14  ;;  %v2160_v20 = vpop.f32.mrb[21].mxu1 }
 0x39c   :  { %v1648_v0 = vpop.f32.mrb[22].mxu1 }
 0x39d   :  { %v1661_v21 = vadd.f32 %v2670_v63, %v1652_v19  ;;  %v1653_v22 = vadd.f32 %v1648_v0, %v1536_v16  ;;  %v2161_v23 = vpop.f32.mrb[23].mxu1 }
 0x39f   :  { %v1663_v24 = vadd.f32 %v1661_v21, %v2555_v42  ;;  %v1662_v26 = vadd.f32 %v2670_v63, %v1653_v22 }
 0x3a1   :  { %1666 = vst [vmem:[#allocation9 + $0x10] sm:$0xff] %v1663_v24  ;;  %v1664_v27 = vadd.f32 %v1662_v26, %v2557_v43 }
 0x3a3   :  { %1667 = vst [vmem:[#allocation9 + $0x18] sm:$0xff] %v1664_v27 }
 0x3a4   :  { %2358 = shalt.err (!%p2355_p0)
}
 0x3a5   :  { %s2359_s12 = scalar_lea.hbm %s2718_s5, 512 }
 0x3a6   :  { %p2360_p1 = scmp.ne.s32.totalorder %s2718_s5, %s2359_s12  ;;  %p2363_p2 = scmp.lt.u32.totalorder %s2359_s12, %s2718_s5 }
 0x3a8   :  { %p2365_p3 = pnand %p2363_p2, %p2360_p1 }
 0x3aa   :  { %2368 = shalt.err (!%p2365_p3)
}
 0x3ab   :  { %1679 = dma.vmem_to_hbm [thread:$0]  %s1674_s8, 512, %s2718_s5, [#allocation5], %s2379_s1, %s2379_s1, %s2380_s17  }
 0x3ac   :  { %2373 = dma.done.wait [#allocation5], 512  }
 0x3ad   :  { %2374 = vsyncadd [#allocation5], 4294966784 }
 0x3ae   :  { %1683 = vsyncpa [#allocation4], 1 }
 0x3af   :  { %1684 = vsyncpa [#allocation7], 1 }
 0x3b0   :  { %1685 = vsyncpa [#allocation5], 1 }

</bundles_post_ra>
